<compile_context>
chip_gen: v7x
topology: tpu7x:2x2x1
jax: 0.10.0
libtpu: 0.0.40
codegen_flags: <defaults>
</compile_context>

<pallas_src>
import jax
import jax.numpy as jnp
from jax.experimental import pallas as pl
from jax.experimental.pallas import tpu as pltpu


def _round_up(x: int, m: int) -> int:
    return (x + m - 1) // m * m


# -----------------------------------------------------------------------------
# Kernel
# -----------------------------------------------------------------------------
def critic_kernel(x_ref, w1_ref, b1_ref, w2_ref, b2_ref, w3_ref, b3_ref, o_ref):
    Hp = w3_ref.shape[1]                     # lane-padded hidden width (static)

    # ---- Layer 1: single bf16 MXU dot over the fused [obs, action] input,
    # both heads fused along the lane/output dim (2*Hp columns), f32 accum.
    h1 = jnp.dot(x_ref[...], w1_ref[...], preferred_element_type=jnp.float32)
    h1 = jnp.maximum(h1 + b1_ref[...], 0.0)                 # (tb, 2*Hp) f32
    h1b = h1.astype(jnp.bfloat16)                           # bf16 LHS for layer 2

    # ---- Layer 2 (per head). The Hp-slices sit on 128-lane boundaries.
    b2 = b2_ref[...]                                         # (2, Hp) f32
    h2_1 = jnp.dot(h1b[:, :Hp], w2_ref[0], preferred_element_type=jnp.float32)
    h2_2 = jnp.dot(h1b[:, Hp:], w2_ref[1], preferred_element_type=jnp.float32)
    h2_1 = jnp.maximum(h2_1 + b2[0:1, :], 0.0)               # (tb, Hp) f32
    h2_2 = jnp.maximum(h2_2 + b2[1:2, :], 0.0)               # (tb, Hp) f32

    # ---- Layer 3: width-1 output per head -> VPU multiply + XLU row-sum
    # (avoids an N=1 MXU matmul); columns written directly, no 1-lane concat.
    w3 = w3_ref[...]                                         # (2, Hp) f32
    b3 = b3_ref[...]                                         # (1, 2)  f32
    o_ref[:, 0:1] = jnp.sum(h2_1 * w3[0:1, :], axis=-1, keepdims=True) + b3[:, 0:1]
    o_ref[:, 1:2] = jnp.sum(h2_2 * w3[1:2, :], axis=-1, keepdims=True) + b3[:, 1:2]


# -----------------------------------------------------------------------------
# Wrapper
# -----------------------------------------------------------------------------
def sacae_critic_forward(obs, action, packed_params, *, tb=None):
    """Returns (q1, q2), each (B, 1), from a single fused pallas_call."""
    assert obs.shape[0] == action.shape[0]
    w1, b1, w2, b2, w3, b3 = packed_params

    B = obs.shape[0]
    K = obs.shape[1] + action.shape[1]
    Kp = w1.shape[0]                      # padded input width (matches packed W1)
    Hp = w3.shape[1]                      # lane-padded hidden width
    assert Kp >= K

    # Fused [obs, action] input in bf16 (input bytes are negligible vs. the
    # 2*Hp^2 weight stream); pad input width to the packed W1 rows (zeros).
    x = jnp.concatenate(
        [obs.astype(jnp.float32), action.astype(jnp.float32)], axis=1
    ).astype(jnp.bfloat16)
    if Kp != K:
        x = jnp.pad(x, ((0, 0), (0, Kp - K)))

    # Batch tile from an explicit activation budget (~16 MiB of f32/bf16
    # temporaries) and >=2 balanced grid steps whenever B allows, so the
    # second v7x TensorCore gets work and padding waste stays bounded.
    if tb is None:
        tb_cap = max(64, min(512, ((16 << 20) // (32 * Hp)) // 16 * 16))
        n_tiles = max(2, pl.cdiv(B, tb_cap))
        tb = min(tb_cap, _round_up(pl.cdiv(B, n_tiles), 16))
    Bp = _round_up(B, tb)
    if Bp != B:
        x = jnp.pad(x, ((0, Bp - B), (0, 0)))

    # Explicit VMEM budget: single-buffered bf16 weights + double-buffered
    # x/out tiles + activation temporaries, with margin; capped at 48 MiB
    # (headroom under v7x's 64 MiB/TC, above v5e's 16 MiB scoped default).
    weight_bytes = Kp * 2 * Hp * 2 + 2 * Hp * Hp * 2 + 6 * Hp * 4 + 64
    io_bytes = 2 * (tb * Kp * 2) + 2 * (tb * 2 * 4)
    act_bytes = tb * 2 * Hp * 4 * 4
    vmem_limit = int(min(48 << 20,
                         max(32 << 20,
                             weight_bytes + io_bytes + act_bytes + (4 << 20))))

    resident = pl.Buffered(1)             # constant blocks: one buffer, DMA'd once

    out = pl.pallas_call(
        critic_kernel,
        out_shape=jax.ShapeDtypeStruct((Bp, 2), jnp.float32),
        grid=(Bp // tb,),
        in_specs=[
            pl.BlockSpec((tb, Kp), lambda i: (i, 0)),                     # x tile
            pl.BlockSpec((Kp, 2 * Hp), lambda i: (0, 0),
                         pipeline_mode=resident),                         # W1 (bf16)
            pl.BlockSpec((1, 2 * Hp), lambda i: (0, 0),
                         pipeline_mode=resident),                         # b1
            pl.BlockSpec((2, Hp, Hp), lambda i: (0, 0, 0),
                         pipeline_mode=resident),                         # W2 (bf16)
            pl.BlockSpec((2, Hp), lambda i: (0, 0),
                         pipeline_mode=resident),                         # b2
            pl.BlockSpec((2, Hp), lambda i: (0, 0),
                         pipeline_mode=resident),                         # w3
            pl.BlockSpec((1, 2), lambda i: (0, 0),
                         pipeline_mode=resident),                         # b3
        ],
        out_specs=pl.BlockSpec((tb, 2), lambda i: (i, 0)),
        compiler_params=pltpu.CompilerParams(
            dimension_semantics=("parallel",),                            # megacore
            vmem_limit_bytes=vmem_limit),
    )(x, w1, b1, w2, b2, w3, b3)

    q = out[:B]
    return q[:, 0:1], q[:, 1:2]


# -----------------------------------------------------------------------------
# Parameter construction (matches nn.Linear default init, (in, out) layout)
# -----------------------------------------------------------------------------
def init_qfunction_params(key, obs_dim, action_dim, hidden_dim):
    """Per-head params: U(-1/sqrt(fan_in), 1/sqrt(fan_in)), weights (in, out)."""
    def linear(key, fan_in, fan_out):
        kw, kb = jax.random.split(key)
        bound = 1.0 / jnp.sqrt(fan_in)
        w = jax.random.uniform(kw, (fan_in, fan_out), jnp.float32, -bound, bound)
        b = jax.random.uniform(kb, (1, fan_out), jnp.float32, -bound, bound)
        return w, b

    k1, k2, k3 = jax.random.split(key, 3)
    in_dim = obs_dim + action_dim
    w1, b1 = linear(k1, in_dim, hidden_dim)
    w2, b2 = linear(k2, hidden_dim, hidden_dim)
    w3, b3 = linear(k3, hidden_dim, 1)
    return (w1, b1, w2, b2, w3, b3)


def pack_critic_params(q1_params, q2_params, obs_dim, action_dim, hidden_dim,
                       lane=128):
    """Fuse the two Q-heads; lane-pad hidden to 128; bf16 for the big weights.

    Padded lanes / rows get zero weights & biases so they contribute exactly 0.
    """
    Hp = _round_up(hidden_dim, lane)
    K = obs_dim + action_dim
    Kp = _round_up(K, 16)            # bf16 sublane packing alignment
    h = hidden_dim

    w1p = jnp.zeros((Kp, 2 * Hp), jnp.float32)
    b1p = jnp.zeros((1, 2 * Hp), jnp.float32)
    w2p = jnp.zeros((2, Hp, Hp), jnp.float32)
    b2p = jnp.zeros((2, Hp), jnp.float32)
    w3p = jnp.zeros((2, Hp), jnp.float32)
    b3p = jnp.zeros((1, 2), jnp.float32)

    for head, (w1, b1, w2, b2, w3, b3) in enumerate((q1_params, q2_params)):
        lo = head * Hp
        w1p = w1p.at[:K, lo:lo + h].set(w1)
        b1p = b1p.at[:, lo:lo + h].set(b1.reshape(1, -1))
        w2p = w2p.at[head, :h, :h].set(w2)
        b2p = b2p.at[head, :h].set(b2.reshape(-1))
        w3p = w3p.at[head, :h].set(w3.reshape(-1))
        b3p = b3p.at[0, head].set(b3.reshape(()))

    # Big streamed weights in bf16 (f32 accumulation inside the kernel);
    # small biases and the width-1 head weights stay f32.
    return (w1p.astype(jnp.bfloat16), b1p,
            w2p.astype(jnp.bfloat16), b2p, w3p, b3p)


# -----------------------------------------------------------------------------
# Pure-JAX reference (f32)
# -----------------------------------------------------------------------------
def _qfunction_ref(x, params):
    w1, b1, w2, b2, w3, b3 = params
    h1 = jnp.maximum(x @ w1 + b1, 0.0)
    h2 = jnp.maximum(h1 @ w2 + b2, 0.0)
    return h2 @ w3 + b3


def critic_ref(obs, action, q1_params, q2_params):
    x = jnp.concatenate([obs, action], axis=1)
    return _qfunction_ref(x, q1_params), _qfunction_ref(x, q2_params)


# -----------------------------------------------------------------------------
# Self-test
# -----------------------------------------------------------------------------
if __name__ == "__main__":
    B, obs_dim, action_dim, hidden_dim = 8, 24, 8, 32

    key = jax.random.PRNGKey(0)
    k_obs, k_act, k_q1, k_q2 = jax.random.split(key, 4)
    obs = jax.random.normal(k_obs, (B, obs_dim), jnp.float32)
    action = jax.random.normal(k_act, (B, action_dim), jnp.float32)

    q1_params = init_qfunction_params(k_q1, obs_dim, action_dim, hidden_dim)
    q2_params = init_qfunction_params(k_q2, obs_dim, action_dim, hidden_dim)
    packed = pack_critic_params(q1_params, q2_params, obs_dim, action_dim,
                                hidden_dim)

    q1, q2 = sacae_critic_forward(obs, action, packed)
    q1, q2 = jax.block_until_ready((q1, q2))

    r1, r2 = critic_ref(obs, action, q1_params, q2_params)
    assert q1.shape == (B, 1) and q2.shape == (B, 1)
    # bf16 weights / activations with f32 accumulation -> loosened tolerance.
    assert jnp.allclose(q1, r1, atol=3e-2, rtol=3e-2), "Q1 mismatch vs reference"
    assert jnp.allclose(q2, r2, atol=3e-2, rtol=3e-2), "Q2 mismatch vs reference"

    print("KERNEL_OK")
</pallas_src>

<mosaic_0001>
module attributes {stable_mosaic.version = 11 : i64} {
  func.func @critic_kernel(%arg0: i32, %arg1: memref<16x32xbf16, #tpu.memory_space<vmem>>, %arg2: memref<32x256xbf16, #tpu.memory_space<vmem>>, %arg3: memref<1x256xf32, #tpu.memory_space<vmem>>, %arg4: memref<2x128x128xbf16, #tpu.memory_space<vmem>>, %arg5: memref<2x128xf32, #tpu.memory_space<vmem>>, %arg6: memref<2x128xf32, #tpu.memory_space<vmem>>, %arg7: memref<1x2xf32, #tpu.memory_space<vmem>>, %arg8: memref<16x2xf32, #tpu.memory_space<vmem>>) attributes {dimension_semantics = [#tpu.dimension_semantics<parallel>], iteration_bounds = array<i64: 1>, scalar_prefetch = 0 : i64, scratch_operands = 0 : i64, tpu.core_type = #tpu.core_type<tc>, window_params = [{transform_indices = @transform_0, window_bounds = array<i64: 16, 32>}, {pipeline_mode = #tpu.pipeline_mode<synchronous>, transform_indices = @transform_1, window_bounds = array<i64: 32, 256>}, {pipeline_mode = #tpu.pipeline_mode<synchronous>, transform_indices = @transform_2, window_bounds = array<i64: 1, 256>}, {pipeline_mode = #tpu.pipeline_mode<synchronous>, transform_indices = @transform_3, window_bounds = array<i64: 2, 128, 128>}, {pipeline_mode = #tpu.pipeline_mode<synchronous>, transform_indices = @transform_4, window_bounds = array<i64: 2, 128>}, {pipeline_mode = #tpu.pipeline_mode<synchronous>, transform_indices = @transform_5, window_bounds = array<i64: 2, 128>}, {pipeline_mode = #tpu.pipeline_mode<synchronous>, transform_indices = @transform_6, window_bounds = array<i64: 1, 2>}, {transform_indices = @transform_7, window_bounds = array<i64: 16, 2>}]} {
    %c0 = arith.constant 0 : index
    %c0_0 = arith.constant 0 : index
    %0 = vector.load %arg1[%c0, %c0_0] : memref<16x32xbf16, #tpu.memory_space<vmem>>, vector<16x32xbf16>
    %c0_1 = arith.constant 0 : index
    %c0_2 = arith.constant 0 : index
    %1 = vector.load %arg2[%c0_1, %c0_2] : memref<32x256xbf16, #tpu.memory_space<vmem>>, vector<32x256xbf16>
    %cst = arith.constant dense<0.000000e+00> : vector<16x256xf32>
    %2 = tpu.matmul %0, %1, %cst {dimension_numbers = #tpu.dot_dimension_numbers<[1], [0], [0], [1], [0, 0, 1, 1], [], []>} : vector<16x32xbf16>, vector<32x256xbf16>, vector<16x256xf32> -> vector<16x256xf32>
    %c0_3 = arith.constant 0 : index
    %c0_4 = arith.constant 0 : index
    %3 = vector.load %arg3[%c0_3, %c0_4] : memref<1x256xf32, #tpu.memory_space<vmem>>, vector<1x256xf32>
    %4 = vector.broadcast %3 : vector<1x256xf32> to vector<16x256xf32>
    %5 = arith.addf %2, %4 : vector<16x256xf32>
    %cst_5 = arith.constant 0.000000e+00 : f32
    %6 = vector.broadcast %cst_5 : f32 to vector<16x256xf32>
    %7 = arith.maximumf %5, %6 : vector<16x256xf32>
    %8 = arith.truncf %7 : vector<16x256xf32> to vector<16x256xbf16>
    %c0_6 = arith.constant 0 : index
    %c0_7 = arith.constant 0 : index
    %9 = vector.load %arg5[%c0_6, %c0_7] : memref<2x128xf32, #tpu.memory_space<vmem>>, vector<2x128xf32>
    %10 = vector.extract_strided_slice %8 {offsets = [0, 0], sizes = [16, 128], strides = [1, 1]} : vector<16x256xbf16> to vector<16x128xbf16>
    %c0_8 = arith.constant 0 : index
    %c0_9 = arith.constant 0 : index
    %c0_10 = arith.constant 0 : index
    %11 = vector.load %arg4[%c0_8, %c0_9, %c0_10] : memref<2x128x128xbf16, #tpu.memory_space<vmem>>, vector<1x128x128xbf16>
    %12 = vector.shape_cast %11 : vector<1x128x128xbf16> to vector<128x128xbf16>
    %cst_11 = arith.constant dense<0.000000e+00> : vector<16x128xf32>
    %13 = tpu.matmul %10, %12, %cst_11 {dimension_numbers = #tpu.dot_dimension_numbers<[1], [0], [0], [1], [0, 0, 1, 1], [], []>} : vector<16x128xbf16>, vector<128x128xbf16>, vector<16x128xf32> -> vector<16x128xf32>
    %14 = vector.extract_strided_slice %8 {offsets = [0, 128], sizes = [16, 128], strides = [1, 1]} : vector<16x256xbf16> to vector<16x128xbf16>
    %c1 = arith.constant 1 : index
    %c0_12 = arith.constant 0 : index
    %c0_13 = arith.constant 0 : index
    %15 = vector.load %arg4[%c1, %c0_12, %c0_13] : memref<2x128x128xbf16, #tpu.memory_space<vmem>>, vector<1x128x128xbf16>
    %16 = vector.shape_cast %15 : vector<1x128x128xbf16> to vector<128x128xbf16>
    %cst_14 = arith.constant dense<0.000000e+00> : vector<16x128xf32>
    %17 = tpu.matmul %14, %16, %cst_14 {dimension_numbers = #tpu.dot_dimension_numbers<[1], [0], [0], [1], [0, 0, 1, 1], [], []>} : vector<16x128xbf16>, vector<128x128xbf16>, vector<16x128xf32> -> vector<16x128xf32>
    %18 = vector.extract_strided_slice %9 {offsets = [0, 0], sizes = [1, 128], strides = [1, 1]} : vector<2x128xf32> to vector<1x128xf32>
    %19 = vector.broadcast %18 : vector<1x128xf32> to vector<16x128xf32>
    %20 = arith.addf %13, %19 : vector<16x128xf32>
    %cst_15 = arith.constant 0.000000e+00 : f32
    %21 = vector.broadcast %cst_15 : f32 to vector<16x128xf32>
    %22 = arith.maximumf %20, %21 : vector<16x128xf32>
    %23 = vector.extract_strided_slice %9 {offsets = [1, 0], sizes = [1, 128], strides = [1, 1]} : vector<2x128xf32> to vector<1x128xf32>
    %24 = vector.broadcast %23 : vector<1x128xf32> to vector<16x128xf32>
    %25 = arith.addf %17, %24 : vector<16x128xf32>
    %cst_16 = arith.constant 0.000000e+00 : f32
    %26 = vector.broadcast %cst_16 : f32 to vector<16x128xf32>
    %27 = arith.maximumf %25, %26 : vector<16x128xf32>
    %c0_17 = arith.constant 0 : index
    %c0_18 = arith.constant 0 : index
    %28 = vector.load %arg6[%c0_17, %c0_18] : memref<2x128xf32, #tpu.memory_space<vmem>>, vector<2x128xf32>
    %c0_19 = arith.constant 0 : index
    %c0_20 = arith.constant 0 : index
    %29 = vector.load %arg7[%c0_19, %c0_20] : memref<1x2xf32, #tpu.memory_space<vmem>>, vector<1x2xf32>
    %30 = vector.extract_strided_slice %28 {offsets = [0, 0], sizes = [1, 128], strides = [1, 1]} : vector<2x128xf32> to vector<1x128xf32>
    %31 = vector.broadcast %30 : vector<1x128xf32> to vector<16x128xf32>
    %32 = arith.mulf %22, %31 : vector<16x128xf32>
    %cst_21 = arith.constant dense<0.000000e+00> : vector<16xf32>
    %33 = vector.multi_reduction <add>, %32, %cst_21 [1] : vector<16x128xf32> to vector<16xf32>
    %34 = vector.shape_cast %33 : vector<16xf32> to vector<16x1xf32>
    %35 = vector.extract_strided_slice %29 {offsets = [0, 0], sizes = [1, 1], strides = [1, 1]} : vector<1x2xf32> to vector<1x1xf32>
    %36 = vector.broadcast %35 : vector<1x1xf32> to vector<16x1xf32>
    %37 = arith.addf %34, %36 : vector<16x1xf32>
    %c0_22 = arith.constant 0 : index
    %c0_23 = arith.constant 0 : index
    %38 = vector.load %arg8[%c0_22, %c0_23] : memref<16x2xf32, #tpu.memory_space<vmem>>, vector<16x1xf32>
    tpu.vector_store %arg8[%c0_22, %c0_23], %37 {strides = array<i32>} : memref<16x2xf32, #tpu.memory_space<vmem>>, vector<16x1xf32>,
    %39 = vector.extract_strided_slice %28 {offsets = [1, 0], sizes = [1, 128], strides = [1, 1]} : vector<2x128xf32> to vector<1x128xf32>
    %40 = vector.broadcast %39 : vector<1x128xf32> to vector<16x128xf32>
    %41 = arith.mulf %27, %40 : vector<16x128xf32>
    %cst_24 = arith.constant dense<0.000000e+00> : vector<16xf32>
    %42 = vector.multi_reduction <add>, %41, %cst_24 [1] : vector<16x128xf32> to vector<16xf32>
    %43 = vector.shape_cast %42 : vector<16xf32> to vector<16x1xf32>
    %44 = vector.extract_strided_slice %29 {offsets = [0, 1], sizes = [1, 1], strides = [1, 1]} : vector<1x2xf32> to vector<1x1xf32>
    %45 = vector.broadcast %44 : vector<1x1xf32> to vector<16x1xf32>
    %46 = arith.addf %43, %45 : vector<16x1xf32>
    %c0_25 = arith.constant 0 : index
    %c1_26 = arith.constant 1 : index
    %47 = vector.load %arg8[%c0_25, %c1_26] : memref<16x2xf32, #tpu.memory_space<vmem>>, vector<16x1xf32>
    tpu.vector_store %arg8[%c0_25, %c1_26], %46 {strides = array<i32>} : memref<16x2xf32, #tpu.memory_space<vmem>>, vector<16x1xf32>,
    return
  }
  func.func @transform_0(%arg0: i32) -> (i32, i32) {
    %c0_i32 = arith.constant 0 : i32
    %c0_i32_0 = arith.constant 0 : i32
    return %arg0, %c0_i32 : i32, i32
  }
  func.func @transform_1(%arg0: i32) -> (i32, i32) {
    %c0_i32 = arith.constant 0 : i32
    %c0_i32_0 = arith.constant 0 : i32
    %c0_i32_1 = arith.constant 0 : i32
    return %c0_i32, %c0_i32_0 : i32, i32
  }
  func.func @transform_2(%arg0: i32) -> (i32, i32) {
    %c0_i32 = arith.constant 0 : i32
    %c0_i32_0 = arith.constant 0 : i32
    %c0_i32_1 = arith.constant 0 : i32
    return %c0_i32, %c0_i32_0 : i32, i32
  }
  func.func @transform_3(%arg0: i32) -> (i32, i32, i32) {
    %c0_i32 = arith.constant 0 : i32
    %c0_i32_0 = arith.constant 0 : i32
    %c0_i32_1 = arith.constant 0 : i32
    %c0_i32_2 = arith.constant 0 : i32
    return %c0_i32, %c0_i32_0, %c0_i32_1 : i32, i32, i32
  }
  func.func @transform_4(%arg0: i32) -> (i32, i32) {
    %c0_i32 = arith.constant 0 : i32
    %c0_i32_0 = arith.constant 0 : i32
    %c0_i32_1 = arith.constant 0 : i32
    return %c0_i32, %c0_i32_0 : i32, i32
  }
  func.func @transform_5(%arg0: i32) -> (i32, i32) {
    %c0_i32 = arith.constant 0 : i32
    %c0_i32_0 = arith.constant 0 : i32
    %c0_i32_1 = arith.constant 0 : i32
    return %c0_i32, %c0_i32_0 : i32, i32
  }
  func.func @transform_6(%arg0: i32) -> (i32, i32) {
    %c0_i32 = arith.constant 0 : i32
    %c0_i32_0 = arith.constant 0 : i32
    %c0_i32_1 = arith.constant 0 : i32
    return %c0_i32, %c0_i32_0 : i32, i32
  }
  func.func @transform_7(%arg0: i32) -> (i32, i32) {
    %c0_i32 = arith.constant 0 : i32
    %c0_i32_0 = arith.constant 0 : i32
    return %arg0, %c0_i32 : i32, i32
  }
}

</mosaic_0001>

<bundles_post_ra>
// kernel: tpu_custom_call.1
= control target key start
LH: loop header
LB: loop body
LE: loop exit
PB: predicated region body
PF: predicated region fallthrough
CT: control target
= control target key end

     0   :  { %12 = vsyncpa [#allocation3], 0  ;;  %s726_s0 = inlined_call_operand.hbm [shape: bf16[16,32], index: 0, kind: input, shape index: {}]   ;;  %s727_s1 = inlined_call_operand.hbm [shape: bf16[32,256], index: 1, kind: input, shape index: {}]   ;;  %s728_s2 = inlined_call_operand.vmem [shape: f32[1,256], index: 2, kind: input, shape index: {}]   ;;  %s729_s3 = inlined_call_operand.hbm [shape: bf16[2,128,128], index: 3, kind: input, shape index: {}]   ;;  %s730_s4 = inlined_call_operand.vmem [shape: f32[2,128], index: 4, kind: input, shape index: {}]   ;;  %s731_s5 = inlined_call_operand.vmem [shape: f32[2,128], index: 5, kind: input, shape index: {}]   ;;  %s732_s6 = inlined_call_operand.vmem [shape: f32[1,2], index: 6, kind: input, shape index: {}]   ;;  %s733_s7 = inlined_call_operand.vmem [shape: f32[16,2], index: 7, kind: output, shape index: {}]  }
   0x1   :  { %13 = vsyncpa [#allocation5], 0  ;;  %s616_s24 = smov [#allocation4]   ;;  %s546_s28 = scalar_lea.hbm %s727_s1, 512 }
   0x2   :  { %s31_s25 = sshll.u32 %s616_s24, 4  ;;  %p547_p0 = scmp.ne.s32.totalorder %s727_s1, %s546_s28  ;;  %s32_s25 = int_to_ptr.vmem [resolvable:$true] %s31_s25 }
   0x3   :  { %p550_p1 = scmp.lt.u32.totalorder %s546_s28, %s727_s1 }
   0x5   :  { %p552_p2 = pnand %p550_p1, %p547_p0 }
   0x7   :  { %555 = shalt.err (!%p552_p2)
}
   0x8   :  { %s556_s10 = scalar_lea.vmem %s32_s25, 512  ;;  %p561_p4 = scmp.lt.s32.totalorder %s32_s25, %s32_s25 }
   0x9   :  { %p557_p3 = scmp.ne.s32.totalorder %s32_s25, %s556_s10  ;;  %p562_p5 = scmp.lt.s32.totalorder %s556_s10, %s556_s10 }
   0xb   :  { %p563_p6 = por %p562_p5, %p561_p4 }
   0xd   :  { %p564_p7 = pnand %p563_p6, %p557_p3 }
   0xf   :  { %567 = shalt.err (!%p564_p7)
}
  0x10   :  { %s617_s11 = smov 128   ;;  %s618_s12 = smov 8  }
  0x11   :  { %37 = dma.hbm_to_vmem [thread:$0]  %s727_s1, 512, %s32_s25, [#allocation5], %s617_s11, %s617_s11, %s618_s12  }
  0x12   :  { %s619_s15 = smov [#allocation2]   ;;  %s568_s19 = scalar_lea.hbm %s726_s0, 128 }
  0x13   :  { %s19_s16 = sshll.u32 %s619_s15, 4  ;;  %p569_p8 = scmp.ne.s32.totalorder %s726_s0, %s568_s19  ;;  %s20_s16 = int_to_ptr.vmem [resolvable:$true] %s19_s16 }
  0x14   :  { %p572_p9 = scmp.lt.u32.totalorder %s568_s19, %s726_s0 }
  0x16   :  { %p574_p10 = pnand %p572_p9, %p569_p8 }
  0x18   :  { %577 = shalt.err (!%p574_p10)
}
  0x19   :  { %s578_s24 = scalar_lea.vmem %s20_s16, 128  ;;  %p583_p12 = scmp.lt.s32.totalorder %s20_s16, %s20_s16 }
  0x1a   :  { %p579_p11 = scmp.ne.s32.totalorder %s20_s16, %s578_s24  ;;  %p584_p13 = scmp.lt.s32.totalorder %s578_s24, %s578_s24 }
  0x1c   :  { %p585_p0 = por %p584_p13, %p583_p12 }
  0x1e   :  { %p586_p1 = pnand %p585_p0, %p579_p11 }
  0x20   :  { %589 = shalt.err (!%p586_p1)
}
  0x21   :  { %s620_s1 = smov 64   ;;  %s621_s25 = smov 4  }
  0x22   :  { %25 = dma.hbm_to_vmem [thread:$0]  %s726_s0, 128, %s20_s16, [#allocation3], %s620_s1, %s620_s1, %s621_s25  }
  0x23   :  { %s622_s28 = smov [#allocation6]   ;;  %s590_s9 = scalar_lea.hbm %s729_s3, 2048 }
  0x24   :  { %s45_s29 = sshll.u32 %s622_s28, 4  ;;  %p591_p2 = scmp.ne.s32.totalorder %s729_s3, %s590_s9  ;;  %s46_s29 = int_to_ptr.vmem [resolvable:$true] %s45_s29 }
  0x25   :  { %p594_p3 = scmp.lt.u32.totalorder %s590_s9, %s729_s3 }
  0x27   :  { %p596_p4 = pnand %p594_p3, %p591_p2 }
  0x29   :  { %599 = shalt.err (!%p596_p4)
}
  0x2a   :  { %s600_s14 = scalar_lea.vmem %s46_s29, 2048  ;;  %p605_p6 = scmp.lt.s32.totalorder %s46_s29, %s46_s29 }
  0x2b   :  { %p601_p5 = scmp.ne.s32.totalorder %s46_s29, %s600_s14  ;;  %p606_p7 = scmp.lt.s32.totalorder %s600_s14, %s600_s14 }
  0x2d   :  { %p607_p8 = por %p606_p7, %p605_p6 }
  0x2f   :  { %p608_p9 = pnand %p607_p8, %p601_p5 }
  0x31   :  { %611 = shalt.err (!%p608_p9)
}
  0x32   :  { %51 = dma.hbm_to_vmem [thread:$0]  %s729_s3, 2048, %s46_s29, [#allocation5], %s620_s1, %s620_s1, %s621_s25  }
  0x33   :  { %612 = dma.done.wait [#allocation3], 128  }
  0x34   :  { %613 = vsyncadd [#allocation3], 4294967168 }
  0x35   :  { %614 = dma.done.wait [#allocation5], 2560  }
  0x36   :  { %615 = vsyncadd [#allocation5], 4294964736  ;;  %v623_v0 = vmov 0   ;;  %v624_v1 = vmov 0.0   ;;  %v523_v2 = vld [vmem:[#allocation4 + $0x4] ss:$8 sps:$4 sm:$0xff]   ;;  %v76_v23 = vlaneseq }
  0x37   :  { %147 = vmatprep.mubr.bf16.mxu0 %v623_v0  ;;  %473 = vmatprep.subr.bf16.mxu1 %v624_v1  ;;  %v525_v3 = vld [vmem:[#allocation4] ss:$8 sps:$4 sm:$0xff]   ;;  %v526_v4 = vld [vmem:[#allocation4 + $0x14] ss:$8 sps:$4 sm:$0xff]   ;;  %v528_v5 = vld [vmem:[#allocation4 + $0x10] ss:$8 sps:$4 sm:$0xff]  }
  0x38   :  { %115 = vmatprep.subr.bf16.mxu0 %v523_v2  ;;  %v530_v6 = vld [vmem:[#allocation6] sm:$0xff]   ;;  %v529_v7 = vld [vmem:[#allocation2] sm:$0xff]   ;;  %v532_v8 = vld [vmem:[#allocation6 + $0x8] sm:$0xff]   ;;  %vm111_vm0 = vcmask 261120   ;;  %vm625_vm1 = vmmov 0   ;;  %v77_v24 = vshrl.u32 %v76_v23, 7 }
  0x39   :  { %116 = vmatpush1.bf16.msra.mxu0 %v525_v3  ;;  %474 = vmatpush3.bf16.msra.mxu1 %v530_v6  ;;  %v531_v9 = vld [vmem:[#allocation6 + $0x40] sm:$0xff]   ;;  %v534_v10 = vld [vmem:[#allocation6 + $0x10] sm:$0xff]   ;;  %v533_v11 = vld [vmem:[#allocation6 + $0x48] sm:$0xff]   ;;  %vm408_vm2 = vcmask 7168   ;;  %vm423_vm3 = vcmask 15368  }
  0x3a   :  { %117 = vmatprep.subr.bf16.mxu0 %v526_v4  ;;  %475 = vmatprep.subr.bf16.mxu1 %v624_v1  ;;  %v536_v12 = vld [vmem:[#allocation6 + $0x18] sm:$0xff]   ;;  %v535_v13 = vld [vmem:[#allocation6 + $0x50] sm:$0xff]   ;;  %v538_v14 = vld [vmem:[#allocation6 + $0x20] sm:$0xff]   ;;  %v78_v25 = vsub.s32 0, %v77_v24  ;;  %v82_v27 = vsub.s32 1, %v77_v24 }
  0x3b   :  { %v537_v15 = vld [vmem:[#allocation6 + $0x58] sm:$0xff]   ;;  %v540_v16 = vld [vmem:[#allocation6 + $0x28] sm:$0xff]   ;;  %v539_v17 = vld [vmem:[#allocation6 + $0x60] sm:$0xff]   ;;  %489 = vmatprep.mubr.msk.bf16.mxu1 %vm625_vm1, %v624_v1 }
  0x3c   :  { %v541_v18 = vld [vmem:[#allocation6 + $0x68] sm:$0xff]   ;;  %v542_v19 = vld [vmem:[#allocation6 + $0x30] sm:$0xff]   ;;  %v544_v21 = vld [vmem:[#allocation6 + $0x38] sm:$0xff]  }
  0x3d   :  { %118 = vmatpush1.bf16.msra.mxu0 %v528_v5  ;;  %476 = vmatpush3.bf16.msra.mxu1 %v532_v8  ;;  %v543_v20 = vld [vmem:[#allocation6 + $0x70] sm:$0xff]   ;;  %v545_v22 = vld [vmem:[#allocation6 + $0x78] sm:$0xff]  }
  0x3e   :  { %493 = vmatprep.subr.bf16.mxu0 %v624_v1  ;;  %477 = vmatprep.subr.bf16.mxu1 %v624_v1  ;;  %v74_v26 = vld [vmem:[%s728_s2] sm:$0x3] }
  0x3f   :  { %v79_v28 = vrot.slane %v74_v26, %v78_v25  ;;  %v83_v29 = vrot.slane %v74_v26, %v82_v27  ;;  %v164_v44 = vld [vmem:[%s730_s4] sm:$0x3] }
  0x40   :  { %437 = vmatmul.mubr.msk.bf16.vlgmr.msra.gmra.mrb[0].mxu0 %vm111_vm0, %v529_v7  ;;  %v201_v45 = vrot.slane %v164_v44, %v78_v25  ;;  %v296_v46 = vrot.slane %v164_v44, %v82_v27  ;;  %v388_v47 = vld [vmem:[%s731_s5] sm:$0x3] }
  0x41   :  { %494 = vmatpush3.bf16.msra.mxu0 %v531_v9  ;;  %478 = vmatpush3.bf16.msra.mxu1 %v534_v10  ;;  %v393_v52 = vrot.slane %v388_v47, %v78_v25  ;;  %v414_v56 = vrot.slane %v388_v47, %v82_v27  ;;  %v454_v6 = vld [vmem:[%s732_s6] ss:$0 sm:$0xff] }
  0x42   :  { %495 = vmatprep.subr.bf16.mxu0 %v624_v1  ;;  %479 = vmatprep.subr.bf16.mxu1 %v624_v1 }
  0x43   :  { %509 = vmatprep.mubr.msk.bf16.mxu0 %vm625_vm1, %v624_v1 }
  0x45   :  { %496 = vmatpush3.bf16.msra.mxu0 %v533_v11  ;;  %480 = vmatpush3.bf16.msra.mxu1 %v536_v12 }
  0x46   :  { %497 = vmatprep.subr.bf16.mxu0 %v624_v1  ;;  %481 = vmatprep.subr.bf16.mxu1 %v624_v1 }
  0x49   :  { %498 = vmatpush3.bf16.msra.mxu0 %v535_v13  ;;  %482 = vmatpush3.bf16.msra.mxu1 %v538_v14 }
  0x4a   :  { %499 = vmatprep.subr.bf16.mxu0 %v624_v1  ;;  %483 = vmatprep.subr.bf16.mxu1 %v624_v1 }
  0x4d   :  { %500 = vmatpush3.bf16.msra.mxu0 %v537_v15  ;;  %484 = vmatpush3.bf16.msra.mxu1 %v540_v16 }
  0x4e   :  { %501 = vmatprep.subr.bf16.mxu0 %v624_v1  ;;  %485 = vmatprep.subr.bf16.mxu1 %v624_v1 }
  0x51   :  { %502 = vmatpush3.bf16.msra.mxu0 %v539_v17  ;;  %486 = vmatpush3.bf16.msra.mxu1 %v542_v19 }
  0x52   :  { %503 = vmatprep.subr.bf16.mxu0 %v624_v1  ;;  %487 = vmatprep.subr.bf16.mxu1 %v624_v1 }
  0x55   :  { %504 = vmatpush3.bf16.msra.mxu0 %v541_v18  ;;  %488 = vmatpush3.bf16.msra.mxu1 %v544_v21 }
  0x56   :  { %505 = vmatprep.subr.bf16.mxu0 %v624_v1 }
  0x59   :  { %506 = vmatpush3.bf16.msra.mxu0 %v543_v20 }
  0x5a   :  { %507 = vmatprep.subr.bf16.mxu0 %v624_v1 }
  0x5d   :  { %508 = vmatpush3.bf16.msra.mxu0 %v545_v22 }
 0x113   :  { %v149_v30 = vpop.f32.mrb[0].mxu0 }
 0x114   :  { %v150_v31 = vadd.f32 %v149_v30, %v79_v28  ;;  %v151_v32 = vpop.f32.mrb[1].mxu0 }
 0x115   :  { %v152_v33 = vadd.f32 %v151_v32, %v83_v29  ;;  %v153_v34 = vpop.f32.mrb[2].mxu0 }
 0x116   :  { %v154_v35 = vadd.f32 %v153_v34, %v79_v28  ;;  %v155_v36 = vpop.f32.mrb[3].mxu0  ;;  %v158_v38 = vmax.f32 %v150_v31, 0.0 }
 0x117   :  { %v156_v37 = vadd.f32 %v155_v36, %v83_v29  ;;  %v159_v40 = vmax.f32 %v152_v33, 0.0 }
 0x118   :  { %v160_v39 = vmax.f32 %v154_v35, 0.0 }
 0x119   :  { %v161_v41 = vmax.f32 %v156_v37, 0.0 }
 0x11a   :  { %v162_v42 = vpack.c.bf16 %v160_v39, %v158_v38 }
 0x11b   :  { %v163_v43 = vpack.c.bf16 %v161_v41, %v159_v40 }
 0x11c   :  { %490 = vmatmul.mubr.bf16.vlgmr.msra.gmra.mrb[0].mxu1 %v162_v42 }
 0x11d   :  { %510 = vmatmul.mubr.bf16.vlgmr.msra.gmra.mrb[4].mxu0 %v163_v43 }
 0x1ef   :  { %v284_v48 = vpop.f32.mrb[0].mxu1 }
 0x1f0   :  { %v285_v49 = vadd.f32 %v284_v48, %v201_v45  ;;  %v491_v50 = vpop.f32.mrb[1].mxu1  ;;  %v379_v51 = vpop.f32.mrb[4].mxu0 }
 0x1f1   :  { %v380_v53 = vadd.f32 %v379_v51, %v296_v46  ;;  %v287_v54 = vpop.f32.mrb[2].mxu1  ;;  %v511_v55 = vpop.f32.mrb[5].mxu0 }
 0x1f2   :  { %v291_v57 = vmax.f32 %v285_v49, 0.0  ;;  %v288_v58 = vadd.f32 %v287_v54, %v201_v45  ;;  %v492_v59 = vpop.f32.mrb[3].mxu1  ;;  %v382_v60 = vpop.f32.mrb[6].mxu0 }
 0x1f3   :  { %v386_v61 = vmax.f32 %v380_v53, 0.0  ;;  %v383_v62 = vadd.f32 %v382_v60, %v296_v46  ;;  %v512_v63 = vpop.f32.mrb[7].mxu0 }
 0x1f4   :  { %v292_v0 = vmax.f32 %v288_v58, 0.0  ;;  %v394_v1 = vmul.f32 %v393_v52, %v291_v57 }
 0x1f5   :  { %v387_v2 = vmax.f32 %v383_v62, 0.0  ;;  %v415_v3 = vmul.f32 %v414_v56, %v386_v61 }
 0x1f6   :  { %396 = vadd.xlane.f32.xlu0 %v394_v1  ;;  %v395_v4 = vmul.f32 %v393_v52, %v292_v0 }
 0x1f7   :  { %417 = vadd.xlane.f32.xlu1 %v415_v3  ;;  %v416_v5 = vmul.f32 %v414_v56, %v387_v2 }
 0x1fa   :  { %398 = vadd.xlane.f32.xlu0 %v395_v4 }
 0x1fb   :  { %419 = vadd.xlane.f32.xlu1 %v416_v5 }
 0x283   :  { %v397_v7 = vpop.xlane.xlu0 %396 }
 0x284   :  { %v406_v8 = vadd.f32 %v454_v6, %v397_v7  ;;  %v418_v9 = vpop.xlane.xlu1 %417 }
 0x285   :  { %v421_v10 = vadd.f32 %v454_v6, %v418_v9 }
 0x286   :  { %409 = vst.msk [vmem:[%s733_s7] sm:$0xff] %vm408_vm2, %v406_v8 }
 0x287   :  { %424 = vst.msk [vmem:[%s733_s7] sm:$0xff] %vm423_vm3, %v421_v10  ;;  %v399_v11 = vpop.xlane.xlu0 %398 }
 0x288   :  { %v407_v12 = vadd.f32 %v454_v6, %v399_v11  ;;  %v420_v13 = vpop.xlane.xlu1 %419 }
 0x289   :  { %v422_v14 = vadd.f32 %v454_v6, %v420_v13 }
 0x28a   :  { %410 = vst.msk [vmem:[%s733_s7 + $0x8] sm:$0xff] %vm408_vm2, %v407_v12 }
 0x28b   :  { %425 = vst.msk [vmem:[%s733_s7 + $0x8] sm:$0xff] %vm423_vm3, %v422_v14 }
 0x28c   :  { %430 = vsyncpa [#allocation3], 1 }
 0x28d   :  { %431 = vsyncpa [#allocation5], 1 }

</bundles_post_ra>
